<compile_context>
chip_gen: v5e
topology: v5e:2x2
jax: 0.10.0
libtpu: 0.0.40
codegen_flags: <defaults>
</compile_context>

<pallas_src>
import math
import functools

import jax
import jax.numpy as jnp
from jax import lax
from jax.experimental import pallas as pl
from jax.experimental.pallas import tpu as pltpu


# ----------------------------------------------------------------------------
# helpers
# ----------------------------------------------------------------------------
def _pick_tile(dim, target, align):
    """Largest tile <= target that is a multiple of `align` and divides `dim`;
    falls back to the full dimension (always a legal BlockSpec block)."""
    if dim <= target:
        return dim
    t = (target // align) * align
    while t >= align:
        if dim % t == 0:
            return t
        t -= align
    return dim


_DEFAULT_SCOPED_VMEM = 32 * 1024 * 1024


def _vmem_limit(working_set_bytes):
    """Raise the scoped-VMEM limit only when the double-buffered working set
    approaches the 32 MiB default; otherwise keep the compiler default."""
    if working_set_bytes <= _DEFAULT_SCOPED_VMEM // 2:
        return None
    return int(min(working_set_bytes * 3 // 2, 128 * 1024 * 1024))


# ----------------------------------------------------------------------------
# Tiled linear (nn.Linear, bias=False) on the MXU
# ----------------------------------------------------------------------------
def _matmul_kernel(x_ref, w_ref, o_ref, acc_ref):
    @pl.when(pl.program_id(2) == 0)
    def _():
        acc_ref[...] = jnp.zeros_like(acc_ref)

    acc_ref[...] += jnp.dot(x_ref[...], w_ref[...],
                            preferred_element_type=jnp.float32)

    @pl.when(pl.program_id(2) == pl.num_programs(2) - 1)
    def _():
        o_ref[...] = acc_ref[...].astype(o_ref.dtype)


def pallas_linear(x, w, *, tm=256, tn=256, tk=512):
    """x: (M, K) @ w: (K, N) -> (M, N); tiled + double-buffered matmul."""
    M, K = x.shape
    K2, N = w.shape
    assert K == K2
    tm = _pick_tile(M, tm, 8)
    tn = _pick_tile(N, tn, 128)
    tk = _pick_tile(K, tk, 128)
    grid = (M // tm, N // tn, K // tk)

    itemsize = x.dtype.itemsize
    vmem_bytes = 2 * (tm * tk + tk * tn + tm * tn) * itemsize + tm * tn * 4
    cost = pl.CostEstimate(
        flops=2 * M * N * K,
        transcendentals=0,
        bytes_accessed=(M * K + K * N + M * N) * itemsize,
    )
    return pl.pallas_call(
        _matmul_kernel,
        out_shape=jax.ShapeDtypeStruct((M, N), x.dtype),
        grid_spec=pltpu.PrefetchScalarGridSpec(
            num_scalar_prefetch=0,
            grid=grid,
            in_specs=[
                pl.BlockSpec((tm, tk), lambda i, j, k: (i, k)),
                pl.BlockSpec((tk, tn), lambda i, j, k: (k, j)),
            ],
            out_specs=pl.BlockSpec((tm, tn), lambda i, j, k: (i, j)),
            scratch_shapes=[pltpu.VMEM((tm, tn), jnp.float32)],
        ),
        compiler_params=pltpu.CompilerParams(
            dimension_semantics=("parallel", "parallel", "arbitrary"),
            vmem_limit_bytes=_vmem_limit(vmem_bytes),
        ),
        cost_estimate=cost,
    )(x, w)


# ----------------------------------------------------------------------------
# Flash-style multi-head dot-product attention, heads packed on the lane axis
# ----------------------------------------------------------------------------
def _flash_mha_kernel(vl_ref, q_ref, k_ref, v_ref, o_ref,
                      m_scr, l_scr, acc_scr, *, num_heads, head_dim, scale):
    # One (batch, q-tile, kv-tile) step.
    b = pl.program_id(0)
    ki = pl.program_id(2)
    Tq = q_ref.shape[1]
    Tk = k_ref.shape[1]

    @pl.when(ki == 0)
    def _():
        m_scr[...] = jnp.full(m_scr.shape, -jnp.inf, dtype=jnp.float32)
        l_scr[...] = jnp.zeros(l_scr.shape, dtype=jnp.float32)
        acc_scr[...] = jnp.zeros(acc_scr.shape, dtype=jnp.float32)

    valid = vl_ref[b]
    col = ki * Tk + lax.broadcasted_iota(jnp.int32, (Tq, Tk), 1)
    keep = col < valid                                       # (Tq, Tk)

    q_all = q_ref[0] * scale                                 # (Tq, H*d), pre-scaled q
    k_all = k_ref[0]                                         # (Tk, H*d)
    v_all = v_ref[0]                                         # (Tk, H*d)

    for h in range(num_heads):
        sl = slice(h * head_dim, (h + 1) * head_dim)
        # scores = (q / sqrt(d)) @ k^T -- contraction on last dims, no k.T copy.
        s = lax.dot_general(q_all[:, sl], k_all[:, sl],
                            dimension_numbers=(((1,), (1,)), ((), ())),
                            preferred_element_type=jnp.float32)    # (Tq, Tk)
        s = jnp.where(keep, s, jnp.float32(-1e6))            # d2l masked_softmax fill

        m_prev = m_scr[h]                                     # (Tq, 1)
        m_new = jnp.maximum(m_prev, jnp.max(s, axis=-1, keepdims=True))
        alpha = jnp.exp(m_prev - m_new)
        p = jnp.exp(s - m_new)                                # (Tq, Tk)

        l_scr[h] = alpha * l_scr[h] + jnp.sum(p, axis=-1, keepdims=True)
        acc_scr[h] = alpha * acc_scr[h] + jnp.dot(
            p.astype(v_all.dtype), v_all[:, sl],
            preferred_element_type=jnp.float32)
        m_scr[h] = m_new

    @pl.when(ki == pl.num_programs(2) - 1)
    def _():
        outs = []
        for h in range(num_heads):
            inv = pl.reciprocal(l_scr[h], approx=True)        # EUP reciprocal, (Tq, 1)
            outs.append(acc_scr[h] * inv)
        # Single lane-dense (Tq, H*d) store.
        o_ref[0] = jnp.concatenate(outs, axis=-1).astype(o_ref.dtype)


def pallas_mha_attention(q, k, v, valid_lens, num_heads, *, q_tile=256, kv_tile=512):
    """q: (B, Lq, H*d), k/v: (B, Lk, H*d), valid_lens: (B,) int32 -> (B, Lq, H*d)."""
    B, Lq, HD = q.shape
    _, Lk, _ = k.shape
    assert HD % num_heads == 0
    d = HD // num_heads
    scale = 1.0 / math.sqrt(d)

    Tq = _pick_tile(Lq, q_tile, 8)
    Tk = _pick_tile(Lk, kv_tile, 8)
    grid = (B, Lq // Tq, Lk // Tk)

    kernel = functools.partial(_flash_mha_kernel, num_heads=num_heads,
                               head_dim=d, scale=scale)

    itemsize = q.dtype.itemsize
    vmem_bytes = (2 * (2 * Tq * HD + 2 * Tk * HD) * itemsize          # dbl-buffered q/k/v/o
                  + num_heads * Tq * (2 * 128 + max(d, 128)) * 4)     # lane-padded scratch
    cost = pl.CostEstimate(
        flops=4 * B * num_heads * Lq * Lk * d,
        transcendentals=B * num_heads * Lq * Lk,
        bytes_accessed=(2 * B * Lq * HD + 2 * B * Lk * HD) * itemsize,
    )

    grid_spec = pltpu.PrefetchScalarGridSpec(
        num_scalar_prefetch=1,
        grid=grid,
        in_specs=[
            pl.BlockSpec((1, Tq, HD), lambda b, qi, ki, vl: (b, qi, 0)),
            pl.BlockSpec((1, Tk, HD), lambda b, qi, ki, vl: (b, ki, 0)),
            pl.BlockSpec((1, Tk, HD), lambda b, qi, ki, vl: (b, ki, 0)),
        ],
        out_specs=pl.BlockSpec((1, Tq, HD), lambda b, qi, ki, vl: (b, qi, 0)),
        scratch_shapes=[
            pltpu.VMEM((num_heads, Tq, 1), jnp.float32),   # running max  m
            pltpu.VMEM((num_heads, Tq, 1), jnp.float32),   # running sum  l
            pltpu.VMEM((num_heads, Tq, d), jnp.float32),   # running out  acc
        ],
    )
    return pl.pallas_call(
        kernel,
        grid_spec=grid_spec,
        out_shape=jax.ShapeDtypeStruct((B, Lq, HD), q.dtype),
        compiler_params=pltpu.CompilerParams(
            dimension_semantics=("parallel", "parallel", "arbitrary"),
            vmem_limit_bytes=_vmem_limit(vmem_bytes),
        ),
        cost_estimate=cost,
    )(valid_lens, q, k, v)


# ----------------------------------------------------------------------------
# MultiHeadAttention forward (parameters passed as a dict of weights)
# ----------------------------------------------------------------------------
def init_mha_params(key, key_size, query_size, value_size, hidden_size):
    k1, k2, k3, k4 = jax.random.split(key, 4)
    # Stored transposed vs. torch (in_features, out_features) so y = x @ W.
    def lin(k, fan_in, fan_out):
        bound = 1.0 / math.sqrt(fan_in)
        return jax.random.uniform(k, (fan_in, fan_out), jnp.float32, -bound, bound)
    return {
        "W_q": lin(k1, query_size, hidden_size),
        "W_k": lin(k2, key_size, hidden_size),
        "W_v": lin(k3, value_size, hidden_size),
        "W_o": lin(k4, hidden_size, hidden_size),
    }


def multi_head_attention(params, queries, keys, values, valid_lens, num_heads):
    B, Lq, Dq = queries.shape
    _, Lk, Dk = keys.shape
    Dv = values.shape[-1]
    H = params["W_q"].shape[1]

    if queries is keys and keys is values:
        # Self-attention: fused (D, 3H) projection -> one activation read,
        # 3x wider MXU N dimension, one pallas_call instead of three.
        w_qkv = jnp.concatenate([params["W_q"], params["W_k"], params["W_v"]], axis=1)
        qkv = pallas_linear(queries.reshape(B * Lq, Dq), w_qkv)        # (B*Lq, 3H)
        q = qkv[:, :H].reshape(B, Lq, H)
        k = qkv[:, H:2 * H].reshape(B, Lk, H)
        v = qkv[:, 2 * H:].reshape(B, Lk, H)
    else:
        q = pallas_linear(queries.reshape(B * Lq, Dq), params["W_q"]).reshape(B, Lq, H)
        k = pallas_linear(keys.reshape(B * Lk, Dk), params["W_k"]).reshape(B, Lk, H)
        v = pallas_linear(values.reshape(B * Lk, Dv), params["W_v"]).reshape(B, Lk, H)

    # No head split/merge transposes: the attention kernel consumes the packed
    # (B, L, H*d) layout directly and writes the output back in the same layout.
    if valid_lens is None:
        vl = jnp.full((B,), Lk, dtype=jnp.int32)
    else:
        # TODO(synk): 2-D per-query valid_lens (allowed by the d2l API) is not supported.
        vl = valid_lens.astype(jnp.int32)

    out = pallas_mha_attention(q, k, v, vl, num_heads)                 # (B, Lq, H)
    return pallas_linear(out.reshape(B * Lq, H), params["W_o"]).reshape(B, Lq, H)


# ----------------------------------------------------------------------------
# Pure-JAX reference for verification
# ----------------------------------------------------------------------------
def _transpose_qkv(x, num_heads):
    B, L, Dh = x.shape
    x = x.reshape(B, L, num_heads, Dh // num_heads)
    x = jnp.transpose(x, (0, 2, 1, 3))
    return x.reshape(B * num_heads, L, Dh // num_heads)


def _transpose_output(x, num_heads):
    BH, L, d = x.shape
    B = BH // num_heads
    x = x.reshape(B, num_heads, L, d)
    x = jnp.transpose(x, (0, 2, 1, 3))
    return x.reshape(B, L, num_heads * d)


def reference_mha(params, queries, keys, values, valid_lens, num_heads):
    B, Lq, _ = queries.shape
    _, Lk, _ = keys.shape
    q = _transpose_qkv(queries @ params["W_q"], num_heads)
    k = _transpose_qkv(keys @ params["W_k"], num_heads)
    v = _transpose_qkv(values @ params["W_v"], num_heads)
    d = q.shape[-1]
    scores = jnp.einsum("bqd,bkd->bqk", q, k) / math.sqrt(d)
    if valid_lens is not None:
        vl = jnp.repeat(valid_lens.astype(jnp.int32), num_heads, axis=0)
        mask = jnp.arange(Lk)[None, None, :] < vl[:, None, None]
        scores = jnp.where(mask, scores, -1e6)
    w = jax.nn.softmax(scores, axis=-1)
    out = jnp.einsum("bqk,bkd->bqd", w, v)
    out = _transpose_output(out, num_heads)
    return out @ params["W_o"]


# ----------------------------------------------------------------------------
# Main
# ----------------------------------------------------------------------------
if __name__ == "__main__":
    key = jax.random.PRNGKey(0)
    kq, kk, kv, kp, kx = jax.random.split(key, 5)

    B, Lq, Lk = 2, 8, 8
    query_size = key_size = value_size = 32
    hidden_size = 32
    num_heads = 4

    params = init_mha_params(kp, key_size, query_size, value_size, hidden_size)

    # Case 1: distinct q/k/v activations + per-batch valid_lens (separate projections).
    queries = jax.random.normal(kq, (B, Lq, query_size), jnp.float32)
    keys_in = jax.random.normal(kk, (B, Lk, key_size), jnp.float32)
    values_in = jax.random.normal(kv, (B, Lk, value_size), jnp.float32)
    valid_lens = jnp.array([3, 6], dtype=jnp.int32)

    out = multi_head_attention(params, queries, keys_in, values_in, valid_lens, num_heads)
    out = jax.block_until_ready(out)
    ref = reference_mha(params, queries, keys_in, values_in, valid_lens, num_heads)
    assert out.shape == (B, Lq, hidden_size)
    assert jnp.allclose(out, ref, atol=5e-3, rtol=5e-3)

    # Case 2: self-attention (same tensor for q/k/v) exercises the fused QKV matmul.
    x = jax.random.normal(kx, (B, Lq, query_size), jnp.float32)
    out2 = multi_head_attention(params, x, x, x, None, num_heads)
    out2 = jax.block_until_ready(out2)
    ref2 = reference_mha(params, x, x, x, None, num_heads)
    assert jnp.allclose(out2, ref2, atol=5e-3, rtol=5e-3)

    print("KERNEL_OK")
</pallas_src>

<mosaic_0001>
module attributes {stable_mosaic.version = 11 : i64} {
  func.func @_matmul_kernel(%arg0: i32, %arg1: i32, %arg2: i32, %arg3: memref<16x32xf32, #tpu.memory_space<vmem>>, %arg4: memref<32x32xf32, #tpu.memory_space<vmem>>, %arg5: memref<16x32xf32, #tpu.memory_space<vmem>>, %arg6: memref<16x32xf32, #tpu.memory_space<vmem>>) attributes {dimension_semantics = [#tpu.dimension_semantics<parallel>, #tpu.dimension_semantics<parallel>, #tpu.dimension_semantics<arbitrary>], iteration_bounds = array<i64: 1, 1, 1>, scalar_prefetch = 0 : i64, scratch_operands = 1 : i64, tpu.core_type = #tpu.core_type<tc>, window_params = [{transform_indices = @transform_0, window_bounds = array<i64: 16, 32>}, {transform_indices = @transform_1, window_bounds = array<i64: 32, 32>}, {transform_indices = @transform_2, window_bounds = array<i64: 16, 32>}]} {
    %c0_i32 = arith.constant 0 : i32
    %0 = arith.cmpi eq, %arg2, %c0_i32 : i32
    %1 = arith.extui %0 : i1 to i32
    %c0_i32_0 = arith.constant 0 : i32
    %2 = arith.cmpi ne, %1, %c0_i32_0 : i32
    scf.if %2 {
      %cst_10 = arith.constant 0.000000e+00 : f32
      %12 = vector.broadcast %cst_10 : f32 to vector<16x32xf32>
      %c0_11 = arith.constant 0 : index
      %c0_12 = arith.constant 0 : index
      %13 = vector.load %arg6[%c0_11, %c0_12] : memref<16x32xf32, #tpu.memory_space<vmem>>, vector<16x32xf32>
      tpu.vector_store %arg6[%c0_11, %c0_12], %12 {strides = array<i32>} : memref<16x32xf32, #tpu.memory_space<vmem>>, vector<16x32xf32>,
    } else {
    }
    %c0 = arith.constant 0 : index
    %c0_1 = arith.constant 0 : index
    %3 = vector.load %arg6[%c0, %c0_1] : memref<16x32xf32, #tpu.memory_space<vmem>>, vector<16x32xf32>
    %c0_2 = arith.constant 0 : index
    %c0_3 = arith.constant 0 : index
    %4 = vector.load %arg3[%c0_2, %c0_3] : memref<16x32xf32, #tpu.memory_space<vmem>>, vector<16x32xf32>
    %c0_4 = arith.constant 0 : index
    %c0_5 = arith.constant 0 : index
    %5 = vector.load %arg4[%c0_4, %c0_5] : memref<32x32xf32, #tpu.memory_space<vmem>>, vector<32x32xf32>
    %cst = arith.constant dense<0.000000e+00> : vector<16x32xf32>
    %6 = tpu.matmul %4, %5, %cst {dimension_numbers = #tpu.dot_dimension_numbers<[1], [0], [0], [1], [0, 0, 1, 1], [], []>} : vector<16x32xf32>, vector<32x32xf32>, vector<16x32xf32> -> vector<16x32xf32>
    %7 = arith.addf %3, %6 : vector<16x32xf32>
    %c0_6 = arith.constant 0 : index
    %c0_7 = arith.constant 0 : index
    %8 = vector.load %arg6[%c0_6, %c0_7] : memref<16x32xf32, #tpu.memory_space<vmem>>, vector<16x32xf32>
    tpu.vector_store %arg6[%c0_6, %c0_7], %7 {strides = array<i32>} : memref<16x32xf32, #tpu.memory_space<vmem>>, vector<16x32xf32>,
    %c0_i32_8 = arith.constant 0 : i32
    %9 = arith.cmpi eq, %arg2, %c0_i32_8 : i32
    %10 = arith.extui %9 : i1 to i32
    %c0_i32_9 = arith.constant 0 : i32
    %11 = arith.cmpi ne, %10, %c0_i32_9 : i32
    scf.if %11 {
      %c0_10 = arith.constant 0 : index
      %c0_11 = arith.constant 0 : index
      %12 = vector.load %arg6[%c0_10, %c0_11] : memref<16x32xf32, #tpu.memory_space<vmem>>, vector<16x32xf32>
      %c0_12 = arith.constant 0 : index
      %c0_13 = arith.constant 0 : index
      %13 = vector.load %arg5[%c0_12, %c0_13] : memref<16x32xf32, #tpu.memory_space<vmem>>, vector<16x32xf32>
      tpu.vector_store %arg5[%c0_12, %c0_13], %12 {strides = array<i32>} : memref<16x32xf32, #tpu.memory_space<vmem>>, vector<16x32xf32>,
    } else {
    }
    return
  }
  func.func @transform_0(%arg0: i32, %arg1: i32, %arg2: i32) -> (i32, i32) {
    %c0_i32 = arith.constant 0 : i32
    return %arg0, %arg2 : i32, i32
  }
  func.func @transform_1(%arg0: i32, %arg1: i32, %arg2: i32) -> (i32, i32) {
    %c0_i32 = arith.constant 0 : i32
    return %arg2, %arg1 : i32, i32
  }
  func.func @transform_2(%arg0: i32, %arg1: i32, %arg2: i32) -> (i32, i32) {
    %c0_i32 = arith.constant 0 : i32
    return %arg0, %arg1 : i32, i32
  }
}

</mosaic_0001>

<bundles_post_ra>
// kernel: tpu_custom_call.1
= control target key start
LH: loop header
LB: loop body
LE: loop exit
PB: predicated region body
PF: predicated region fallthrough
CT: control target
= control target key end

     0   :  { %7 = vsyncpa [#allocation4], 0  ;;  %s257_s0 = inlined_call_operand.hbm [shape: f32[16,32], index: 0, kind: input, shape index: {}]   ;;  %s258_s1 = inlined_call_operand.hbm [shape: f32[32,32], index: 1, kind: input, shape index: {}]   ;;  %s259_s2 = inlined_call_operand.hbm [shape: f32[16,32], index: 2, kind: output, shape index: {}]  }
   0x1   :  { %8 = vsyncpa [#allocation7], 0 }
   0x2   :  { %9 = vsyncpa [#allocation5], 0  ;;  %s14_s11 = sshll.u32 %s257_s0, 4  ;;  %s210_s12 = smov [#allocation3]   ;;  %s15_s11 = int_to_ptr.hbm [resolvable:$true] %s14_s11 }
   0x3   :  { %s16_s13 = sshll.u32 %s210_s12, 4  ;;  %s27_s16 = sshll.u32 %s258_s1, 4  ;;  %s17_s13 = int_to_ptr.vmem [resolvable:$true] %s16_s13  ;;  %s28_s16 = int_to_ptr.hbm [resolvable:$true] %s27_s16 }
   0x4   :  { %s211_s17 = smov 128   ;;  %s212_s18 = smov 8  }
   0x5   :  { %22 = dma.hbm_to_vmem [thread:$0]  %s15_s11, 256, %s17_s13, [#allocation4], %s211_s17, %s211_s17, %s212_s18  }
   0x6   :  { %s213_s19 = smov [#allocation6]  }
   0x7   :  { %s29_s20 = sshll.u32 %s213_s19, 4  ;;  %s30_s20 = int_to_ptr.vmem [resolvable:$true] %s29_s20 }
   0x8   :  { %35 = dma.hbm_to_vmem [thread:$0]  %s28_s16, 512, %s30_s20, [#allocation7], %s211_s17, %s211_s17, %s212_s18  }
   0x9   :  { %204 = dma.done.wait [#allocation4], 256  }
   0xa   :  { %205 = vsyncadd [#allocation4], 4294967040 }
   0xb   :  { %206 = dma.done.wait [#allocation7], 512  }
   0xc   :  { %207 = vsyncadd [#allocation7], 4294966784  ;;  %vm48_vm0 = vcmask 261120   ;;  %v214_v0 = vmov 0.0   ;;  %v58_v1 = vld [vmem:[#allocation6 + $0x18] sm:$0xff]  ;;  %v57_v2 = vld [vmem:[#allocation6 + $0x10] sm:$0xff] }
   0xd   :  { %49 = vst.msk [vmem:[#allocation2] sm:$0xff] %vm48_vm0, %v214_v0  ;;  %78 = vmatpush.msra.mxu0 %v58_v1  ;;  %122 = vmatpush.msra.mxu1 %v58_v1  ;;  %v56_v3 = vld [vmem:[#allocation6 + $0x8] sm:$0xff]  ;;  %v55_v4 = vld [vmem:[#allocation6] sm:$0xff]  ;;  %v53_v5 = vld [vmem:[#allocation3] sm:$0xff]  ;;  %s215_s0 = smov [#allocation8]   ;;  %s106_s23 = sshll.u32 %s259_s2, 4  ;;  %s107_s23 = int_to_ptr.hbm [resolvable:$true] %s106_s23 }
   0xe   :  { %50 = vst.msk [vmem:[#allocation2 + $0x8] sm:$0xff] %vm48_vm0, %v214_v0  ;;  %v54_v6 = vld [vmem:[#allocation3 + $0x8] sm:$0xff]  ;;  %s104_s1 = sshll.u32 %s215_s0, 4  ;;  %s105_s1 = int_to_ptr.vmem [resolvable:$true] %s104_s1 }
   0xf   :  { %79 = vmatpush.msra.mxu0 %v57_v2  ;;  %123 = vmatpush.msra.mxu1 %v57_v2 }
  0x11   :  { %80 = vmatpush.msra.mxu0 %v56_v3  ;;  %124 = vmatpush.msra.mxu1 %v56_v3 }
  0x13   :  { %81 = vmatpush.msra.mxu0 %v55_v4  ;;  %125 = vmatpush.msra.mxu1 %v55_v4 }
  0x14   :  { %120 = vmatmul.msk.f32.vlgmr.msra.gmra.mxu0 %vm48_vm0, %v53_v5  ;;  %121 = vmatmul.msk.f32.vlgmr.msra.gmra.mxu1 %vm48_vm0, %v54_v6  ;;  %v51_v7 = vld [vmem:[#allocation2] sm:$0xff] }
  0x15   :  { %v52_v8 = vld [vmem:[#allocation2 + $0x8] sm:$0xff] }
  0x91   :  { %v83_v9 = vpop.f32.mrf.mxu0  ;;  %v86_v10 = vpop.f32.mrf.mxu1 }
  0x92   :  { %v89_v11 = vadd.f32 %v83_v9, %v51_v7  ;;  %v90_v12 = vadd.f32 %v86_v10, %v52_v8 }
  0x94   :  { %91 = vst.msk [vmem:[#allocation2] sm:$0xff] %vm48_vm0, %v89_v11 }
  0x95   :  { %92 = vst.msk [vmem:[#allocation2 + $0x8] sm:$0xff] %vm48_vm0, %v90_v12 }
  0x9b   :  { %v96_v13 = vld [vmem:[#allocation2] sm:$0xff] }
  0x9c   :  { %v97_v14 = vld [vmem:[#allocation2 + $0x8] sm:$0xff]  ;;  %98 = vst.msk [vmem:[#allocation8] sm:$0xff] %vm48_vm0, %v96_v13 }
  0x9d   :  { %99 = vst.msk [vmem:[#allocation8 + $0x8] sm:$0xff] %vm48_vm0, %v97_v14 }
  0x9e   :  { %112 = dma.vmem_to_hbm [thread:$0]  %s105_s1, 256, %s107_s23, [#allocation5], %s211_s17, %s211_s17, %s212_s18  }
  0x9f   :  { %208 = dma.done.wait [#allocation5], 256  }
  0xa0   :  { %209 = vsyncadd [#allocation5], 4294967040 }
  0xa1   :  { %117 = vsyncpa [#allocation4], 1 }
  0xa2   :  { %118 = vsyncpa [#allocation7], 1 }
  0xa3   :  { %119 = vsyncpa [#allocation5], 1 }

</bundles_post_ra>
